<compile_context>
chip_gen: v7x
topology: tpu7x:2x2x1
jax: 0.10.0
libtpu: 0.0.40
codegen_flags: <defaults>
</compile_context>

<pallas_src>
import functools
import math

import jax
import jax.numpy as jnp
from jax.experimental import pallas as pl
from jax.experimental.pallas import tpu as pltpu

_LANE = 128
_TARGET_BLOCK_BYTES = 4 * 1024 * 1024  # ~4 MiB/block (v7x-friendly per review)


def _fused_copy_kernel(fuse_fn, x_ref, o_ref):
    # Straight lane-aligned tile: no in-kernel reshape, so Mosaic emits no
    # relayout; fuse_fn is the only per-element work and hides under the DMA.
    o_ref[...] = fuse_fn(x_ref[...]).astype(o_ref.dtype)


def _choose_blocks(rows: int, cols: int, itemsize: int):
    """Pick lane/sublane-dense block sizes (bn, bd) for a (rows, cols) slab.

    `cols` is a multiple of 128 by construction in the caller.
    """
    sub = max(8, 32 // itemsize)  # sublane tile: 8 f32, 16 bf16, 32 int8

    # Lane (last) dim: multiple of 128, capped at 2048 lanes per block.
    bd = min(cols, 16 * _LANE)

    # Sublane (row) dim: ~4 MiB per block; 4x (double-buffered in+out) stays
    # well under the 32 MiB scoped-VMEM limit and v7x's 64 MiB physical VMEM.
    if rows <= sub:
        bn = rows  # full-dim exception to the sublane-multiple rule
    else:
        target_rows = max(
            sub, (_TARGET_BLOCK_BYTES // max(1, bd * itemsize)) // sub * sub
        )
        bn = max(sub, min(target_rows, (rows // sub) * sub))

    # Ensure at least one "parallel" grid axis has >= 2 steps when possible so
    # v7x's two TensorCores both get work even for single-block shapes.
    if pl.cdiv(rows, bn) == 1 and pl.cdiv(cols, bd) == 1:
        if cols >= 2 * _LANE:
            bd = pl.cdiv(cols, 2 * _LANE) * _LANE
        elif rows >= 2 * sub:
            bn = max(sub, ((rows + 1) // 2 // sub) * sub)
    return bn, bd


def _run_fused_copy(slab, fuse_fn, out_dtype, donate: bool):
    rows, cols = slab.shape
    in_itemsize = jnp.dtype(slab.dtype).itemsize
    out_itemsize = jnp.dtype(out_dtype).itemsize
    bn, bd = _choose_blocks(rows, cols, in_itemsize)
    grid = (pl.cdiv(rows, bn), pl.cdiv(cols, bd))

    aliases = {0: 0} if (donate and out_dtype == slab.dtype) else {}

    return pl.pallas_call(
        functools.partial(_fused_copy_kernel, fuse_fn),
        out_shape=jax.ShapeDtypeStruct((rows, cols), out_dtype),
        grid=grid,
        in_specs=[pl.BlockSpec((bn, bd), lambda i, j: (i, j))],
        out_specs=pl.BlockSpec((bn, bd), lambda i, j: (i, j)),
        input_output_aliases=aliases,
        compiler_params=pltpu.CompilerParams(
            dimension_semantics=("parallel", "parallel"),
            vmem_limit_bytes=32 * 1024 * 1024,
        ),
        cost_estimate=pl.CostEstimate(
            flops=rows * cols,  # ~1 op/elem from fuse_fn; purely advisory
            transcendentals=0,
            bytes_accessed=rows * cols * (in_itemsize + out_itemsize),
        ),
    )(slab)


def flatten(x: jax.Array, fuse_fn=None, *, donate_input: bool = False) -> jax.Array:
    """Pallas equivalent of torch Flatten: (N, ...) -> (N, prod(...)).

    By default this is a free metadata reshape (no kernel launched).  Pass
    `fuse_fn` (an elementwise function) to fuse real per-element compute into
    a single bandwidth-bound Pallas copy kernel.
    """
    n = x.shape[0]
    d = math.prod(x.shape[1:])
    # Free metadata reshape of the contiguous array; matches
    # torch .contiguous().view(N, -1) row-major ordering exactly.
    x2 = jnp.reshape(x, (n, d))

    if fuse_fn is None:
        # Biggest win (per review): no pallas_call, zero extra HBM traffic.
        return x2

    out_dtype = jax.eval_shape(fuse_fn, jax.ShapeDtypeStruct((), x.dtype)).dtype
    total = n * d
    if total == 0:
        return jnp.zeros((n, d), dtype=out_dtype)

    if d % _LANE == 0:
        # Already lane-dense; kernel output is the semantic (N, D) result.
        return _run_fused_copy(x2, fuse_fn, out_dtype, donate_input)

    # D is not a multiple of 128: present a lane-dense flat slab to the kernel
    # (elementwise fuse_fn is order-independent) and handle the small tail in
    # plain JAX.  Avoids masked partial stores and oversized (8, D) blocks.
    flat = jnp.reshape(x2, (total,))
    cols = min(16 * _LANE, max(_LANE, (total // _LANE) * _LANE))
    rows = total // cols
    tail = total - rows * cols

    if rows == 0:
        # Too small for a lane-dense slab; elementwise work in plain JAX.
        return jnp.reshape(fuse_fn(flat).astype(out_dtype), (n, d))

    slab = jnp.reshape(flat[: rows * cols], (rows, cols))
    main_out = _run_fused_copy(slab, fuse_fn, out_dtype, donate_input)

    parts = [jnp.reshape(main_out, (rows * cols,))]
    if tail > 0:
        # Tiny (< cols elements) tail; elementwise in plain JAX.
        parts.append(fuse_fn(flat[rows * cols :]).astype(out_dtype))
    out_flat = jnp.concatenate(parts) if len(parts) > 1 else parts[0]
    return jnp.reshape(out_flat, (n, d))


if __name__ == "__main__":
    key = jax.random.PRNGKey(0)
    # Small NCHW input consistent with the module's forward.
    x = jax.random.normal(key, (2, 4, 16, 16), dtype=jnp.float32)
    ref = x.reshape(x.shape[0], -1)

    # 1) Module-equivalent path: free metadata reshape, no kernel launched.
    out = jax.block_until_ready(flatten(x))
    assert out.shape == (2, 4 * 16 * 16), out.shape
    assert out.dtype == x.dtype
    assert jnp.array_equal(out, ref), "flatten (metadata path) mismatch"

    # 2) Fusion-anchor path: exercise the Pallas kernel with fused elementwise
    #    compute (D = 1024 is lane-dense; grid split so both v7x TCs get work).
    out_fused = jax.block_until_ready(flatten(x, fuse_fn=lambda v: v * 2.0))
    assert out_fused.shape == ref.shape and out_fused.dtype == x.dtype
    assert jnp.allclose(out_fused, ref * 2.0), "fused flatten mismatch"

    # 3) Non-128-multiple feature dim: exercises the lane-dense slab + tail path.
    x_odd = jax.random.normal(jax.random.PRNGKey(1), (2, 3, 5, 7), dtype=jnp.float32)
    out_odd = jax.block_until_ready(flatten(x_odd, fuse_fn=lambda v: v + 1.0))
    ref_odd = x_odd.reshape(2, -1) + 1.0
    assert out_odd.shape == (2, 105), out_odd.shape
    assert jnp.allclose(out_odd, ref_odd), "unaligned-D fused flatten mismatch"

    print("KERNEL_OK")
</pallas_src>

<mosaic_0001>
module attributes {stable_mosaic.version = 11 : i64} {
  func.func @_fused_copy_kernel(%arg0: i32, %arg1: i32, %arg2: memref<2x512xf32, #tpu.memory_space<vmem>>, %arg3: memref<2x512xf32, #tpu.memory_space<vmem>>) attributes {dimension_semantics = [#tpu.dimension_semantics<parallel>, #tpu.dimension_semantics<parallel>], iteration_bounds = array<i64: 1, 2>, scalar_prefetch = 0 : i64, scratch_operands = 0 : i64, tpu.core_type = #tpu.core_type<tc>, window_params = [{transform_indices = @transform_0, window_bounds = array<i64: 2, 512>}, {transform_indices = @transform_1, window_bounds = array<i64: 2, 512>}]} {
    %c0 = arith.constant 0 : index
    %c0_0 = arith.constant 0 : index
    %0 = vector.load %arg2[%c0, %c0_0] : memref<2x512xf32, #tpu.memory_space<vmem>>, vector<2x512xf32>
    %cst = arith.constant 2.000000e+00 : f32
    %1 = vector.broadcast %cst : f32 to vector<2x512xf32>
    %2 = arith.mulf %0, %1 : vector<2x512xf32>
    %c0_1 = arith.constant 0 : index
    %c0_2 = arith.constant 0 : index
    %3 = vector.load %arg3[%c0_1, %c0_2] : memref<2x512xf32, #tpu.memory_space<vmem>>, vector<2x512xf32>
    tpu.vector_store %arg3[%c0_1, %c0_2], %2 {strides = array<i32>} : memref<2x512xf32, #tpu.memory_space<vmem>>, vector<2x512xf32>,
    return
  }
  func.func @transform_0(%arg0: i32, %arg1: i32) -> (i32, i32) {
    %c0_i32 = arith.constant 0 : i32
    return %arg0, %arg1 : i32, i32
  }
  func.func @transform_1(%arg0: i32, %arg1: i32) -> (i32, i32) {
    %c0_i32 = arith.constant 0 : i32
    return %arg0, %arg1 : i32, i32
  }
}

</mosaic_0001>

<bundles_post_ra>
// kernel: tpu_custom_call.1
= control target key start
LH: loop header
LB: loop body
LE: loop exit
PB: predicated region body
PF: predicated region fallthrough
CT: control target
= control target key end

     0   :  { %6 = vsyncpa [#allocation3], 0  ;;  %s634_s0 = inlined_call_operand.hbm [shape: f32[2,1024], index: 0, kind: input, shape index: {}]   ;;  %s635_s1 = inlined_call_operand.hbm [shape: f32[2,1024], index: 1, kind: output, shape index: {}]  }
   0x1   :  { %8 = vsyncpa [#allocation3 + $0x1], 0 }
   0x2   :  { %9 = vsyncpa [#allocation4], 0 }
   0x3   :  { %11 = vsyncpa [#allocation4 + $0x1], 0  ;;  %s462_s6 = smov 0   ;;  %s464_s7 = smov 0  }
   0x4   :  { %s466_s8 = smov 0   ;;  %s468_s9 = smov 0  }
   0x5   :  { %s470_s10 = smov 0   ;;  %s472_s11 = smov 0  }
   0x6 LB: > { %s257_s12 = sadd.s32 4294967295, %s448_s11   ;;  %s258_s13 = sadd.s32 4294967294, %s448_s11   ;;  %s448_s11 = sphi %s472_s11, %s17_s11   ;;  %s444_s10 = sphi %s470_s10, %s651_s10   ;;  %s440_s9 = sphi %s468_s9, %s650_s9   ;;  %s436_s8 = sphi %s466_s8, %s649_s8   ;;  %s432_s7 = sphi %s464_s7, %s648_s7   ;;  %s428_s6 = sphi %s462_s6, %s647_s6  }
   0x7   : > { %s26_s14 = sadd.s32 1, %s444_s10  ;;  %s38_s15 = sadd.s32 1, %s436_s8 }
   0x8   : > { %p27_p0 = scmp.ge.s32.totalorder %s26_s14, 2  ;;  %p45_p1 = scmp.ne.s32.totalorder %s436_s8, %s432_s7 }
   0x9   : > { %p46_p2 = scmp.eq.s32.totalorder %s448_s11, 0  ;;  %p51_p3 = scmp.ne.s32.totalorder %s432_s7, %s428_s6 }
   0xa   : > { %s653_s14 = smov (%p27_p0, %s26_s14), 0  ;;  %p52_p5 = scmp.eq.s32.totalorder %s257_s12, 0 }
   0xb   : > { %p503_p4 = por %p46_p2, %p45_p1  ;;  %s34_s17 = ssub.s32 %s444_s10, %s653_s14 }
   0xc   : > { %p77_p6 = scmp.eq.s32.totalorder %s257_s12, 1  ;;  %p36_p7 = scmp.eq.s32.totalorder %s34_s17, 0 }
   0xd   : > { %p509_p8 = por %p52_p5, %p51_p3  ;;  %p83_p10 = scmp.eq.s32.totalorder %s258_s13, 1 }
   0xe   : > { %p513_p9 = por %p77_p6, %p45_p1  ;;  %p286_p13 = scmp.lt.s32.totalorder %s448_s11, 2 }
   0xf   : > { %s518_s20 = scalar_select %p36_p7, %s436_s8, %s38_s15  }
  0x10   : > { %s639_s19 = scalar_select %p513_p9, 1, 0 }
  0x11   : > { %p520_p11 = por %p83_p10, %p51_p3  ;;  %s103_s22 = sand.u32 1, %s436_s8  }
  0x12   : > { %s261_s23 = sshll.u32 %s103_s22, 3  ;;  %s272_s24 = sshll.u32 %s444_s10, 7 }
  0x13   : > { %s640_s21 = scalar_select %p520_p11, 1, 0 }
  0x14   : > { %s531_s27 = scalar_lea.hbm %s634_s0, %s272_s24  ;;  %s107_s28 = scalar_lea.vmem [#allocation2], %s261_s23 }
  0x15   : > { %s117_s29 = sshll.u32 %s107_s28, 4  ;;  %p537_p0 = pnand %p286_p13, %p503_p4  ;;  %s533_s29 = int_to_ptr.vmem [resolvable:$true] %s117_s29 }
  0x16   : > { %s104_s2 = scalar_lea.sflag [#allocation3], %s103_s22  ;;  %s336_s3 = scalar_lea.hbm %s531_s27, 128 }
  0x17   : > { %p337_p3 = scmp.ne.s32.totalorder %s531_s27, %s336_s3  ;;  %p338_p5 = pneg %p537_p0 }
  0x18   : > { %s341_s12 = scalar_lea.hbm %s634_s0, 256  ;;  %p342_p4 = scmp.lt.u32.totalorder %s531_s27, %s634_s0 }
  0x19   : > { %p339_p6 = pnand %p338_p5, %p337_p3  ;;  %p343_p10 = scmp.lt.u32.totalorder %s341_s12, %s336_s3 }
  0x1a   : > { %p345_p12 = scmp.lt.u32.totalorder %s336_s3, %s531_s27 }
  0x1b   : > { %p340_p7 = pneg %p339_p6  ;;  %p344_p13 = por %p343_p10, %p342_p4 }
  0x1d   : > { %p346_p1 = por %p345_p12, %p344_p13 }
  0x1f   : > { %p347_p2 = pnand %p346_p1, %p340_p7 }
  0x21   : > { %350 = shalt.err (!%p347_p2)
}
  0x22   : > { %s351_s16 = scalar_lea.vmem %s533_s29, 128  ;;  %s450_s17 = smov [#allocation2]  }
  0x23   : > { %p352_p3 = scmp.ne.s32.totalorder %s533_s29, %s351_s16  ;;  %s356_s22 = sshll.u32 %s450_s17, 4  ;;  %s357_s22 = int_to_ptr.vmem [resolvable:$false] %s356_s22 }
  0x24   : > { %s358_s23 = scalar_lea.vmem %s357_s22, 256  ;;  %p359_p9 = scmp.lt.s32.totalorder %s533_s29, %s357_s22 }
  0x25   : > { %p354_p6 = pnand %p352_p3, %p338_p5  ;;  %p360_p4 = scmp.lt.s32.totalorder %s358_s23, %s351_s16 }
  0x27   : > { %p355_p11 = pneg %p354_p6  ;;  %p361_p10 = por %p360_p4, %p359_p9 }
  0x29   : > { %p362_p12 = pnand %p361_p10, %p355_p11 }
  0x2b   : > { %365 = shalt.err (!%p362_p12)
}
  0x2c   : > { %281 = dma.hbm_to_vmem [thread:$0]  (!%p537_p0), %s531_s27, 128, %s533_s29, %s104_s2  }
  0x2d   : > { %p642_p1 = scmp.lt.s32.totalorder %s448_s11, 3  ;;  %p643_p2 = scmp.ge.s32.totalorder %s448_s11, 1 }
  0x2f   : > { %p123_p5 = pnand %p643_p2, %p642_p1 }
  0x30   : > { %s573_s24 = sand.u32 (!%p123_p5), 1, %s432_s7  }
  0x31   : > { %126 = sbr.rel (%p123_p5) target bundleno = 83 (0x53), region = 24  ;;  %s265_s25 = sshll.u32 (!%p123_p5), %s573_s24, 3 }
  0x32   : > { %s129_s26 = scalar_lea.sflag (!%p123_p5), [#allocation3], %s573_s24  ;;  %s132_s28 = scalar_lea.vmem (!%p123_p5), [#allocation2], %s265_s25 }
  0x38   : > { %419 = dma.done.wait (%p509_p8), %s129_s26, 128  }
  0x39   : > { %421 = vsyncadd (%p509_p8), %s129_s26, 4294967168  ;;  %s150_s27 = scalar_lea.vmem [#allocation5], %s265_s25  ;;  %s273_s30 = sshll.u32 %s440_s9, 7  ;;  %v153_v0 = vld [vmem:[%s132_s28] sm:$0xff] }
  0x3a   : > { %s173_s29 = sshll.u32 %s150_s27, 4  ;;  %v154_v1 = vmul.f32 2.0, %v153_v0  ;;  %s587_s4 = scalar_lea.hbm %s635_s1, %s273_s30  ;;  %s582_s29 = int_to_ptr.vmem [resolvable:$true] %s173_s29 }
  0x3b   : > { %s157_s18 = scalar_lea.sflag [#allocation4], %s573_s24  ;;  %s366_s5 = scalar_lea.vmem %s582_s29, 128 }
  0x3c   : > { %155 = vst [vmem:[%s150_s27] sm:$0xff] %v154_v1  ;;  %p367_p8 = scmp.ne.s32.totalorder %s582_s29, %s366_s5  ;;  %p644_p9 = scmp.ne.s32.totalorder %s639_s19, 0 }
  0x3d   : > { %s451_s9 = smov [#allocation5]  }
  0x3e   : > { %p368_p11 = pnand %p367_p8, %p644_p9  ;;  %s370_s12 = sshll.u32 %s451_s9, 4  ;;  %s371_s12 = int_to_ptr.vmem [resolvable:$false] %s370_s12 }
  0x3f   : > { %s372_s13 = scalar_lea.vmem %s371_s12, 256  ;;  %p373_p7 = scmp.lt.s32.totalorder %s582_s29, %s371_s12 }
  0x40   : > { %p369_p0 = pneg %p368_p11  ;;  %p374_p13 = scmp.lt.s32.totalorder %s372_s13, %s366_s5 }
  0x42   : > { %p375_p3 = por %p374_p13, %p373_p7 }
  0x44   : > { %p376_p6 = pnand %p375_p3, %p369_p0 }
  0x46   : > { %379 = shalt.err (!%p376_p6)
}
  0x47   : > { %s380_s15 = scalar_lea.hbm %s587_s4, 128  ;;  %s384_s22 = scalar_lea.hbm %s635_s1, 256 }
  0x48   : > { %p381_p4 = scmp.ne.s32.totalorder %s587_s4, %s380_s15  ;;  %p385_p1 = scmp.lt.u32.totalorder %s587_s4, %s635_s1 }
  0x49   : > { %p386_p2 = scmp.lt.u32.totalorder %s384_s22, %s380_s15  ;;  %p388_p8 = scmp.lt.u32.totalorder %s380_s15, %s587_s4 }
  0x4a   : > { %p382_p10 = pnand %p381_p4, %p644_p9 }
  0x4b   : > { %p387_p5 = por %p386_p2, %p385_p1 }
  0x4c   : > { %p383_p12 = pneg %p382_p10 }
  0x4d   : > { %p389_p11 = por %p388_p8, %p387_p5 }
  0x4f   : > { %p390_p0 = pnand %p389_p11, %p383_p12 }
  0x51   : > { %393 = shalt.err (!%p390_p0)
}
  0x52   : > { %276 = dma.vmem_to_hbm [thread:$0]  (%p644_p9), %s582_s29, 128, %s587_s4, %s157_s18  }
  0x53 PF: > { %s185_s25 = sand.u32 1, %s428_s6   ;;  %p645_p7 = scmp.ne.s32.totalorder %s640_s21, 0 }
  0x54   : > { %p646_p13 = scmp.ge.s32.totalorder %s448_s11, 2  ;;  %s186_s26 = scalar_lea.sflag [#allocation4], %s185_s25 }
  0x56   : > { %p283_p3 = pnand %p646_p13, %p645_p7 }
  0x58   : > { %423 = dma.done.wait (!%p283_p3), %s186_s26, 128  }
  0x59   : > { %425 = vsyncadd (!%p283_p3), %s186_s26, 4294967168  ;;  %s17_s11 = sadd.s32 1, %s448_s11   ;;  %s647_s6 = smov %s432_s7 }
  0x5a   : > { %p14_p6 = scmp.ge.s32.totalorder %s17_s11, 4   ;;  %s648_s7 = smov %s436_s8 }
  0x5b   : > { %s649_s8 = smov %s518_s20  ;;  %s650_s9 = smov %s444_s10 }
  0x5c   : > { %s651_s10 = smov %s653_s14  ;;  %16 = sbr.rel (!%p14_p6) target bundleno = 6 (0x6), region = 69 }
  0x63   :  { %191 = vsyncpa [#allocation3], 1 }
  0x64   :  { %193 = vsyncpa [#allocation3 + $0x1], 1 }
  0x65   :  { %194 = vsyncpa [#allocation4], 1 }
  0x66   :  { %196 = vsyncpa [#allocation4 + $0x1], 1 }

</bundles_post_ra>
